<compile_context>
chip_gen: v6e
topology: v6e:2x2x1
jax: 0.10.0
libtpu: 0.0.40
codegen_flags: <defaults>
</compile_context>

<pallas_src>
import functools

import jax
import jax.numpy as jnp
from jax.experimental import pallas as pl
from jax.experimental.pallas import tpu as pltpu

HIDDEN = 128


def _round_up(x: int, m: int) -> int:
    return ((x + m - 1) // m) * m


def dqn_kernel(x_ref, w1_ref, b1_ref, w2_ref, b2_ref, w3_ref, b3_ref, o_ref):
    # layer1 + ReLU (bf16 operands into MXU, f32 accumulate, f32 elementwise)
    x = x_ref[...].astype(jnp.bfloat16)
    h1 = jnp.dot(x, w1_ref[...], preferred_element_type=jnp.float32)
    h1 = jnp.maximum(h1 + b1_ref[...], 0.0)
    # layer2 + ReLU
    h2 = jnp.dot(h1.astype(jnp.bfloat16), w2_ref[...],
                 preferred_element_type=jnp.float32)
    h2 = jnp.maximum(h2 + b2_ref[...], 0.0)
    # layer3 (no activation)
    out = jnp.dot(h2.astype(jnp.bfloat16), w3_ref[...],
                  preferred_element_type=jnp.float32)
    o_ref[...] = (out + b3_ref[...]).astype(o_ref.dtype)


@functools.partial(jax.jit, static_argnames=("tile_b",))
def dqn_forward(x, params, *, tile_b=None):
    """x: (B, n_observations) float32. params: dict of w1,b1,w2,b2,w3,b3.

    Weights are (in_dim, out_dim) (pre-transposed vs torch), so y = x @ W + b.
    """
    x = x.astype(jnp.float32)
    w1 = params["w1"].astype(jnp.bfloat16)
    w2 = params["w2"].astype(jnp.bfloat16)
    w3 = params["w3"].astype(jnp.bfloat16)
    b1 = params["b1"].astype(jnp.float32)
    b2 = params["b2"].astype(jnp.float32)
    b3 = params["b3"].astype(jnp.float32)

    B, n_obs = x.shape
    n_actions = w3.shape[1]

    # Batch tile: a multiple of 8 (sublane), large enough to amortize the
    # ~0.35us per-step overhead; default 512 for replay-sized batches.
    if tile_b is None:
        tile_b = min(512, _round_up(B, 8))
    tile_b = max(8, _round_up(tile_b, 8))

    # Pad batch to a multiple of tile_b (garbage-free: zero rows, sliced off below).
    B_pad = _round_up(B, tile_b)
    if B_pad != B:
        x = jnp.pad(x, ((0, B_pad - B), (0, 0)))
    grid = (B_pad // tile_b,)

    flops = 2 * B_pad * (n_obs * HIDDEN + HIDDEN * HIDDEN + HIDDEN * n_actions)
    bytes_accessed = (
        B_pad * n_obs * 4 + B_pad * n_actions * 4          # x in, out
        + 2 * (n_obs * HIDDEN + HIDDEN * HIDDEN + HIDDEN * n_actions)  # bf16 weights
        + 4 * (2 * HIDDEN + n_actions)                     # f32 biases
    )

    const = lambda shape: pl.BlockSpec(shape, lambda i: (0, 0))

    out = pl.pallas_call(
        dqn_kernel,
        out_shape=jax.ShapeDtypeStruct((B_pad, n_actions), jnp.float32),
        grid=grid,
        in_specs=[
            pl.BlockSpec((tile_b, n_obs), lambda i: (i, 0)),   # x: streamed per tile
            const(w1.shape), const(b1.shape),                  # weights/biases resident
            const(w2.shape), const(b2.shape),
            const(w3.shape), const(b3.shape),
        ],
        out_specs=pl.BlockSpec((tile_b, n_actions), lambda i: (i, 0)),
        compiler_params=pltpu.CompilerParams(
            dimension_semantics=("parallel",),   # v7x: shard batch steps across 2 TCs
        ),
        cost_estimate=pl.CostEstimate(
            flops=flops, transcendentals=0, bytes_accessed=bytes_accessed),
    )(x, w1, b1, w2, b2, w3, b3)

    return out[:B]


def init_dqn_params(key, n_observations, n_actions, hidden=HIDDEN):
    """Deterministic init mirroring nn.Linear's U(-1/sqrt(fan_in), +1/sqrt(fan_in)).

    Weights are stored transposed relative to torch: shape (in_dim, out_dim).
    """
    def linear(key, fan_in, fan_out):
        kw, kb = jax.random.split(key)
        bound = 1.0 / jnp.sqrt(jnp.float32(fan_in))
        w = jax.random.uniform(kw, (fan_in, fan_out), jnp.float32, -bound, bound)
        b = jax.random.uniform(kb, (1, fan_out), jnp.float32, -bound, bound)
        return w, b

    k1, k2, k3 = jax.random.split(key, 3)
    w1, b1 = linear(k1, n_observations, hidden)
    w2, b2 = linear(k2, hidden, hidden)
    w3, b3 = linear(k3, hidden, n_actions)
    return {"w1": w1, "b1": b1, "w2": w2, "b2": b2, "w3": w3, "b3": b3}


def dqn_reference(x, params):
    """Pure-JAX f32 reference for correctness checking."""
    h = jnp.maximum(x @ params["w1"] + params["b1"], 0.0)
    h = jnp.maximum(h @ params["w2"] + params["b2"], 0.0)
    return h @ params["w3"] + params["b3"]


if __name__ == "__main__":
    key = jax.random.PRNGKey(0)
    k_params, k_x = jax.random.split(key)

    batch = 64
    n_observations = 16   # state-space dimension
    n_actions = 4         # number of actions

    params = init_dqn_params(k_params, n_observations, n_actions)
    x = jax.random.normal(k_x, (batch, n_observations), jnp.float32)

    # Small tile to exercise the batch grid (4 steps); default (tile_b=None)
    # picks a large tile for replay-sized batches.
    out = dqn_forward(x, params, tile_b=16)
    out = jax.block_until_ready(out)

    ref = dqn_reference(x, params)
    assert out.shape == (batch, n_actions)
    # bf16 MXU operands with f32 accumulation -> loosened tolerance vs f32 reference.
    assert jnp.allclose(out, ref, atol=3e-2, rtol=3e-2), "mismatch vs reference"

    # Also check a non-tile-divisible batch goes through the padding path correctly.
    out2 = jax.block_until_ready(dqn_forward(x[:37], params, tile_b=16))
    assert out2.shape == (37, n_actions)
    assert jnp.allclose(out2, ref[:37], atol=3e-2, rtol=3e-2), "padded-batch mismatch"

    print("KERNEL_OK")
</pallas_src>

<mosaic_0001>
module attributes {stable_mosaic.version = 11 : i64} {
  func.func @dqn_kernel(%arg0: i32, %arg1: memref<16x16xf32, #tpu.memory_space<vmem>>, %arg2: memref<16x128xbf16, #tpu.memory_space<vmem>>, %arg3: memref<1x128xf32, #tpu.memory_space<vmem>>, %arg4: memref<128x128xbf16, #tpu.memory_space<vmem>>, %arg5: memref<1x128xf32, #tpu.memory_space<vmem>>, %arg6: memref<128x4xbf16, #tpu.memory_space<vmem>>, %arg7: memref<1x4xf32, #tpu.memory_space<vmem>>, %arg8: memref<16x4xf32, #tpu.memory_space<vmem>>) attributes {dimension_semantics = [#tpu.dimension_semantics<parallel>], iteration_bounds = array<i64: 4>, scalar_prefetch = 0 : i64, scratch_operands = 0 : i64, tpu.core_type = #tpu.core_type<tc>, window_params = [{transform_indices = @transform_0, window_bounds = array<i64: 16, 16>}, {pipeline_mode = #tpu.pipeline_mode<synchronous>, transform_indices = @transform_1, window_bounds = array<i64: 16, 128>}, {pipeline_mode = #tpu.pipeline_mode<synchronous>, transform_indices = @transform_2, window_bounds = array<i64: 1, 128>}, {pipeline_mode = #tpu.pipeline_mode<synchronous>, transform_indices = @transform_3, window_bounds = array<i64: 128, 128>}, {pipeline_mode = #tpu.pipeline_mode<synchronous>, transform_indices = @transform_4, window_bounds = array<i64: 1, 128>}, {pipeline_mode = #tpu.pipeline_mode<synchronous>, transform_indices = @transform_5, window_bounds = array<i64: 128, 4>}, {pipeline_mode = #tpu.pipeline_mode<synchronous>, transform_indices = @transform_6, window_bounds = array<i64: 1, 4>}, {transform_indices = @transform_7, window_bounds = array<i64: 16, 4>}]} {
    %c0 = arith.constant 0 : index
    %c0_0 = arith.constant 0 : index
    %0 = vector.load %arg1[%c0, %c0_0] : memref<16x16xf32, #tpu.memory_space<vmem>>, vector<16x16xf32>
    %1 = arith.truncf %0 : vector<16x16xf32> to vector<16x16xbf16>
    %c0_1 = arith.constant 0 : index
    %c0_2 = arith.constant 0 : index
    %2 = vector.load %arg2[%c0_1, %c0_2] : memref<16x128xbf16, #tpu.memory_space<vmem>>, vector<16x128xbf16>
    %cst = arith.constant dense<0.000000e+00> : vector<16x128xf32>
    %3 = tpu.matmul %1, %2, %cst {dimension_numbers = #tpu.dot_dimension_numbers<[1], [0], [0], [1], [0, 0, 1, 1], [], []>} : vector<16x16xbf16>, vector<16x128xbf16>, vector<16x128xf32> -> vector<16x128xf32>
    %c0_3 = arith.constant 0 : index
    %c0_4 = arith.constant 0 : index
    %4 = vector.load %arg3[%c0_3, %c0_4] : memref<1x128xf32, #tpu.memory_space<vmem>>, vector<1x128xf32>
    %5 = vector.broadcast %4 : vector<1x128xf32> to vector<16x128xf32>
    %6 = arith.addf %3, %5 : vector<16x128xf32>
    %cst_5 = arith.constant 0.000000e+00 : f32
    %7 = vector.broadcast %cst_5 : f32 to vector<16x128xf32>
    %8 = arith.maximumf %6, %7 : vector<16x128xf32>
    %9 = arith.truncf %8 : vector<16x128xf32> to vector<16x128xbf16>
    %c0_6 = arith.constant 0 : index
    %c0_7 = arith.constant 0 : index
    %10 = vector.load %arg4[%c0_6, %c0_7] : memref<128x128xbf16, #tpu.memory_space<vmem>>, vector<128x128xbf16>
    %cst_8 = arith.constant dense<0.000000e+00> : vector<16x128xf32>
    %11 = tpu.matmul %9, %10, %cst_8 {dimension_numbers = #tpu.dot_dimension_numbers<[1], [0], [0], [1], [0, 0, 1, 1], [], []>} : vector<16x128xbf16>, vector<128x128xbf16>, vector<16x128xf32> -> vector<16x128xf32>
    %c0_9 = arith.constant 0 : index
    %c0_10 = arith.constant 0 : index
    %12 = vector.load %arg5[%c0_9, %c0_10] : memref<1x128xf32, #tpu.memory_space<vmem>>, vector<1x128xf32>
    %13 = vector.broadcast %12 : vector<1x128xf32> to vector<16x128xf32>
    %14 = arith.addf %11, %13 : vector<16x128xf32>
    %cst_11 = arith.constant 0.000000e+00 : f32
    %15 = vector.broadcast %cst_11 : f32 to vector<16x128xf32>
    %16 = arith.maximumf %14, %15 : vector<16x128xf32>
    %17 = arith.truncf %16 : vector<16x128xf32> to vector<16x128xbf16>
    %c0_12 = arith.constant 0 : index
    %c0_13 = arith.constant 0 : index
    %18 = vector.load %arg6[%c0_12, %c0_13] : memref<128x4xbf16, #tpu.memory_space<vmem>>, vector<128x4xbf16>
    %cst_14 = arith.constant dense<0.000000e+00> : vector<16x4xf32>
    %19 = tpu.matmul %17, %18, %cst_14 {dimension_numbers = #tpu.dot_dimension_numbers<[1], [0], [0], [1], [0, 0, 1, 1], [], []>} : vector<16x128xbf16>, vector<128x4xbf16>, vector<16x4xf32> -> vector<16x4xf32>
    %c0_15 = arith.constant 0 : index
    %c0_16 = arith.constant 0 : index
    %20 = vector.load %arg7[%c0_15, %c0_16] : memref<1x4xf32, #tpu.memory_space<vmem>>, vector<1x4xf32>
    %21 = vector.broadcast %20 : vector<1x4xf32> to vector<16x4xf32>
    %22 = arith.addf %19, %21 : vector<16x4xf32>
    %c0_17 = arith.constant 0 : index
    %c0_18 = arith.constant 0 : index
    %23 = vector.load %arg8[%c0_17, %c0_18] : memref<16x4xf32, #tpu.memory_space<vmem>>, vector<16x4xf32>
    tpu.vector_store %arg8[%c0_17, %c0_18], %22 {strides = array<i32>} : memref<16x4xf32, #tpu.memory_space<vmem>>, vector<16x4xf32>,
    return
  }
  func.func @transform_0(%arg0: i32) -> (i32, i32) {
    %c0_i32 = arith.constant 0 : i32
    %c0_i32_0 = arith.constant 0 : i32
    return %arg0, %c0_i32 : i32, i32
  }
  func.func @transform_1(%arg0: i32) -> (i32, i32) {
    %c0_i32 = arith.constant 0 : i32
    %c0_i32_0 = arith.constant 0 : i32
    %c0_i32_1 = arith.constant 0 : i32
    return %c0_i32, %c0_i32_0 : i32, i32
  }
  func.func @transform_2(%arg0: i32) -> (i32, i32) {
    %c0_i32 = arith.constant 0 : i32
    %c0_i32_0 = arith.constant 0 : i32
    %c0_i32_1 = arith.constant 0 : i32
    return %c0_i32, %c0_i32_0 : i32, i32
  }
  func.func @transform_3(%arg0: i32) -> (i32, i32) {
    %c0_i32 = arith.constant 0 : i32
    %c0_i32_0 = arith.constant 0 : i32
    %c0_i32_1 = arith.constant 0 : i32
    return %c0_i32, %c0_i32_0 : i32, i32
  }
  func.func @transform_4(%arg0: i32) -> (i32, i32) {
    %c0_i32 = arith.constant 0 : i32
    %c0_i32_0 = arith.constant 0 : i32
    %c0_i32_1 = arith.constant 0 : i32
    return %c0_i32, %c0_i32_0 : i32, i32
  }
  func.func @transform_5(%arg0: i32) -> (i32, i32) {
    %c0_i32 = arith.constant 0 : i32
    %c0_i32_0 = arith.constant 0 : i32
    %c0_i32_1 = arith.constant 0 : i32
    return %c0_i32, %c0_i32_0 : i32, i32
  }
  func.func @transform_6(%arg0: i32) -> (i32, i32) {
    %c0_i32 = arith.constant 0 : i32
    %c0_i32_0 = arith.constant 0 : i32
    %c0_i32_1 = arith.constant 0 : i32
    return %c0_i32, %c0_i32_0 : i32, i32
  }
  func.func @transform_7(%arg0: i32) -> (i32, i32) {
    %c0_i32 = arith.constant 0 : i32
    %c0_i32_0 = arith.constant 0 : i32
    return %arg0, %c0_i32 : i32, i32
  }
}

</mosaic_0001>

<bundles_post_ra>
// kernel: dqn_forward.1
= control target key start
LH: loop header
LB: loop body
LE: loop exit
PB: predicated region body
PF: predicated region fallthrough
CT: control target
= control target key end

     0   :  { %s810_s24 = smov 0   ;;  %s917_s0 = inlined_call_operand.vmem [shape: f32[64,16], index: 0, kind: input, shape index: {}]   ;;  %s918_s1 = inlined_call_operand.vmem [shape: bf16[16,128], index: 1, kind: input, shape index: {}]   ;;  %s919_s2 = inlined_call_operand.vmem [shape: f32[1,128], index: 2, kind: input, shape index: {}]   ;;  %s920_s3 = inlined_call_operand.vmem [shape: bf16[128,128], index: 3, kind: input, shape index: {}]   ;;  %s921_s4 = inlined_call_operand.vmem [shape: f32[1,128], index: 4, kind: input, shape index: {}]   ;;  %s922_s5 = inlined_call_operand.vmem [shape: bf16[128,4], index: 5, kind: input, shape index: {}]   ;;  %s923_s6 = inlined_call_operand.vmem [shape: f32[1,4], index: 6, kind: input, shape index: {}]   ;;  %s924_s7 = inlined_call_operand.vmem [shape: f32[64,4], index: 7, kind: output, shape index: {}]  }
   0x1 LB: > { %s635_s25 = sadd.s32 4294967295, %s766_s24   ;;  %p639_p0 = scmp.ge.s32.totalorder %s766_s24, 1  ;;  %s766_s24 = sphi %s810_s24, %s17_s24  }
   0x2   : > { %p238_p1 = scmp.lt.s32.totalorder %s766_s24, 5 }
   0x4   : > { %p239_p2 = pnand %p639_p0, %p238_p1 }
   0x5   : > { %s640_s28 = sshll.u32 (!%p239_p2), %s635_s25, 1 }
   0x6   : > { %242 = sbr.rel (%p239_p2) target bundleno = 623 (0x26f), region = 48  ;;  %p271_p3 = scmp.lt.s32.totalorder (!%p239_p2), %s640_s28, 7 }
   0xb   : > { %v743_v0 = vld [vmem:[%s918_s1] sm:$0xff]   ;;  %v768_v1 = vmov 0.0   ;;  %v744_v2 = vld [vmem:[%s920_s3 + $0x38] sm:$0xff]   ;;  %vm769_vm0 = vmmov 0   ;;  %v745_v3 = vld [vmem:[%s920_s3 + $0x30] sm:$0xff]   ;;  %s926_s28 = smov (!%p271_p3, %s640_s28), 7 }
   0xc   : > { %687 = vmatprep.subr.bf16.mxu0 %v768_v1  ;;  %693 = vmatprep.subr.bf16.mxu1 %v768_v1  ;;  %s641_s10 = sshll.u32 %s926_s28, 3  ;;  %v746_v4 = vld [vmem:[%s920_s3 + $0x28] sm:$0xff]   ;;  %vm301_vm1 = vcmask 130048   ;;  %v747_v8 = vld [vmem:[%s920_s3 + $0x20] sm:$0xff]   ;;  %v748_v9 = vld [vmem:[%s920_s3 + $0x18] sm:$0xff]   ;;  %vm576_vm2 = vcmask 31744  }
   0xd   : > { %688 = vmatpush3.bf16.msra.mxu0 %v743_v0  ;;  %689 = vmatprep.mubr.msk.bf16.mxu0 %vm769_vm0, %v768_v1  ;;  %s274_s15 = scalar_lea.vmem %s917_s0, %s641_s10  ;;  %v749_v10 = vld [vmem:[%s920_s3 + $0x10] sm:$0xff]   ;;  %v750_v11 = vld [vmem:[%s920_s3 + $0x8] sm:$0xff]   ;;  %v751_v12 = vld [vmem:[%s920_s3] sm:$0xff]   ;;  %s280_s9 = scalar_lea.vmem %s924_s7, %s641_s10 }
   0xe   : > { %694 = vmatpush3.bf16.msra.mxu1 %v744_v2  ;;  %709 = vmatprep.mubr.msk.bf16.mxu1 %vm769_vm0, %v768_v1  ;;  %v283_v5 = vld [vmem:[%s274_s15] sm:$0xff]  ;;  %v284_v6 = vld [vmem:[%s274_s15 + $0x8] sm:$0xff]  ;;  %v752_v13 = vld [vmem:[%s922_s5 + $0x38] sm:$0xff]  }
   0xf   : > { %695 = vmatprep.subr.bf16.mxu1 %v768_v1  ;;  %713 = vmatprep.subr.bf16.mxu0 %v768_v1  ;;  %v285_v7 = vpack.c.bf16 %v284_v6, %v283_v5  ;;  %v753_v14 = vld [vmem:[%s922_s5 + $0x30] sm:$0xff]   ;;  %v754_v15 = vld [vmem:[%s922_s5 + $0x28] sm:$0xff]   ;;  %v755_v16 = vld [vmem:[%s922_s5 + $0x20] sm:$0xff]  }
  0x10   : > { %v756_v17 = vld [vmem:[%s922_s5 + $0x18] sm:$0xff]   ;;  %v644_v18 = vld [vmem:[%s919_s2] ss:$0 sm:$0xff]  ;;  %v757_v28 = vld [vmem:[%s922_s5 + $0x10] sm:$0xff]  }
  0x11   : > { %690 = vmatmul.mubr.msk.bf16.vlgmr.msra.gmra.mxu0 %vm301_vm1, %v285_v7  ;;  %v758_v29 = vld [vmem:[%s922_s5 + $0x8] sm:$0xff]   ;;  %v759_v30 = vld [vmem:[%s922_s5] sm:$0xff]  }
  0x12   : > { %696 = vmatpush3.bf16.msra.mxu1 %v745_v3  ;;  %729 = vmatprep.mubr.msk.bf16.mxu0 %vm769_vm0, %v768_v1  ;;  %v647_v31 = vld [vmem:[%s921_s4] ss:$0 sm:$0xff] }
  0x13   : > { %697 = vmatprep.subr.bf16.mxu1 %v768_v1  ;;  %714 = vmatpush3.bf16.msra.mxu0 %v752_v13  ;;  %v656_v41 = vld [vmem:[%s923_s6] ss:$0 sm:$0xff] }
  0x14   : > { %715 = vmatprep.subr.bf16.mxu0 %v768_v1 }
  0x16   : > { %698 = vmatpush3.bf16.msra.mxu1 %v746_v4 }
  0x17   : > { %699 = vmatprep.subr.bf16.mxu1 %v768_v1  ;;  %716 = vmatpush3.bf16.msra.mxu0 %v753_v14 }
  0x18   : > { %717 = vmatprep.subr.bf16.mxu0 %v768_v1 }
  0x1a   : > { %700 = vmatpush3.bf16.msra.mxu1 %v747_v8 }
  0x1b   : > { %701 = vmatprep.subr.bf16.mxu1 %v768_v1  ;;  %718 = vmatpush3.bf16.msra.mxu0 %v754_v15 }
  0x1c   : > { %719 = vmatprep.subr.bf16.mxu0 %v768_v1 }
  0x1e   : > { %702 = vmatpush3.bf16.msra.mxu1 %v748_v9 }
  0x1f   : > { %703 = vmatprep.subr.bf16.mxu1 %v768_v1  ;;  %720 = vmatpush3.bf16.msra.mxu0 %v755_v16 }
  0x20   : > { %721 = vmatprep.subr.bf16.mxu0 %v768_v1 }
  0x22   : > { %704 = vmatpush3.bf16.msra.mxu1 %v749_v10 }
  0x23   : > { %705 = vmatprep.subr.bf16.mxu1 %v768_v1  ;;  %722 = vmatpush3.bf16.msra.mxu0 %v756_v17 }
  0x24   : > { %723 = vmatprep.subr.bf16.mxu0 %v768_v1 }
  0x26   : > { %706 = vmatpush3.bf16.msra.mxu1 %v750_v11 }
  0x27   : > { %707 = vmatprep.subr.bf16.mxu1 %v768_v1  ;;  %724 = vmatpush3.bf16.msra.mxu0 %v757_v28 }
  0x28   : > { %725 = vmatprep.subr.bf16.mxu0 %v768_v1 }
  0x2a   : > { %708 = vmatpush3.bf16.msra.mxu1 %v751_v12 }
  0x2b   : > { %726 = vmatpush3.bf16.msra.mxu0 %v758_v29 }
  0x2c   : > { %727 = vmatprep.subr.bf16.mxu0 %v768_v1 }
  0x2f   : > { %728 = vmatpush3.bf16.msra.mxu0 %v759_v30 }
  0xd1   : > { %v339_v19 = vpop.f32.mrf.mxu0 }
  0xd2   : > { %v340_v21 = vadd.f32 %v644_v18, %v339_v19 }
  0xd3   : > { %v691_v20 = vpop.f32.mrf.mxu0 }
  0xd4   : > { %v346_v25 = vmax.f32 %v340_v21, 0.0 }
  0xd5   : > { %v342_v22 = vpop.f32.mrf.mxu0 }
  0xd6   : > { %v343_v23 = vadd.f32 %v644_v18, %v342_v22 }
  0xd7   : > { %v692_v24 = vpop.f32.mrf.mxu0 }
  0xd8   : > { %v347_v26 = vmax.f32 %v343_v23, 0.0 }
  0xda   : > { %v348_v27 = vpack.c.bf16 %v347_v26, %v346_v25 }
  0xdc   : > { %710 = vmatmul.mubr.bf16.vlgmr.msra.gmra.mxu1 %v348_v27 }
 0x19c   : > { %v454_v32 = vpop.f32.mrf.mxu1 }
 0x19d   : > { %v455_v34 = vadd.f32 %v647_v31, %v454_v32 }
 0x19e   : > { %v711_v33 = vpop.f32.mrf.mxu1 }
 0x19f   : > { %v461_v38 = vmax.f32 %v455_v34, 0.0 }
 0x1a0   : > { %v457_v35 = vpop.f32.mrf.mxu1 }
 0x1a1   : > { %v458_v36 = vadd.f32 %v647_v31, %v457_v35 }
 0x1a2   : > { %v712_v37 = vpop.f32.mrf.mxu1 }
 0x1a3   : > { %v462_v39 = vmax.f32 %v458_v36, 0.0 }
 0x1a5   : > { %v463_v40 = vpack.c.bf16 %v462_v39, %v461_v38 }
 0x1a7   : > { %730 = vmatmul.mubr.bf16.vlgmr.msra.gmra.mxu0 %v463_v40 }
 0x267   : > { %v569_v42 = vpop.f32.mrf.mxu0 }
 0x268   : > { %v570_v43 = vadd.f32 %v656_v41, %v569_v42 }
 0x269   : > { %v731_v44 = vpop.f32.mrf.mxu0 }
 0x26a   : > { %577 = vst.msk [vmem:[%s280_s9] sm:$0xff] %vm576_vm2, %v570_v43 }
 0x26b   : > { %v572_v45 = vpop.f32.mrf.mxu0 }
 0x26c   : > { %v573_v46 = vadd.f32 %v656_v41, %v572_v45 }
 0x26d   : > { %v732_v47 = vpop.f32.mrf.mxu0 }
 0x26e   : > { %578 = vst.msk [vmem:[%s280_s9 + $0x8] sm:$0xff] %vm576_vm2, %v573_v46 }
 0x26f PF: > { %s17_s24 = sadd.s32 1, %s766_s24  }
 0x270   : > { %p14_p4 = scmp.ge.s32.totalorder %s17_s24, 6  }
 0x272   :  { %16 = sbr.rel (!%p14_p4) target bundleno = 1 (0x1), region = 78 }

</bundles_post_ra>
